<compile_context>
chip_gen: v5e
topology: v5e:2x2
jax: 0.10.0
libtpu: 0.0.40
codegen_flags: <defaults>
</compile_context>

<pallas_src>
import jax
import jax.numpy as jnp
from jax.experimental import pallas as pl
from jax.experimental.pallas import tpu as pltpu

_LANE = 128      # TPU lane width: class dim padded to a multiple of this.
_SUBLANE = 8     # sublane granularity for batch tiles.


def _round_up(x, m):
    return ((x + m - 1) // m) * m


def _classifier_kernel(x_ref, w_ref, b_ref, o_ref):
    # x_ref: (tb, H)  w_ref: (H, Cp)  b_ref: (1, Cp)  o_ref: (tb, Cp)
    x = x_ref[...]
    w = w_ref[...]
    if x.dtype != w.dtype:
        # Per-tile cast in VMEM (VPU slot, hidden under the DMA/MXU) instead
        # of a full extra HBM read+write pass in the wrapper.
        x = x.astype(w.dtype)
    acc = jnp.dot(x, w, preferred_element_type=jnp.float32)
    o_ref[...] = (acc + b_ref[...]).astype(o_ref.dtype)


def prepare_classifier_params(weight, bias, *, compute_dtype=jnp.float32):
    """One-time parameter prep (do this OUTSIDE the per-step forward call).

    weight : [C, H]  nn.Linear weight (PyTorch layout)
    bias   : [C]     nn.Linear bias
    compute_dtype : dtype the weight is stored in (use bf16 on v5e to keep
                    its 128x128 MXU off the critical path; f32 elsewhere).
    returns (w_hp [H, Cp], b_hp [1, Cp], C) with Cp = round_up(C, 128),
    zero-padded so padded logit columns are exactly 0 and sliced away.
    """
    C, H = weight.shape
    Cp = _round_up(C, _LANE)
    w_hp = jnp.zeros((H, Cp), dtype=compute_dtype)
    w_hp = w_hp.at[:, :C].set(weight.T.astype(compute_dtype))
    b_hp = jnp.zeros((1, Cp), dtype=jnp.float32)
    b_hp = b_hp.at[:, :C].set(bias.astype(jnp.float32))
    return w_hp, b_hp, C


def _pick_batch_tile(B, tb):
    """Batch-tile selection with the (8,128) rule and v7x even-step balance."""
    if tb is None:
        tb = min(B, 1024)
        if tb != B:
            tb = _round_up(tb, _SUBLANE)
            steps = -(-B // tb)
            if steps > 1 and steps % 2 == 1:
                # v7x has 2 TensorCores: keep the "parallel" axis step count
                # even so neither core sits idle / imbalanced.
                steps += 1
                tb = _round_up(-(-B // steps), _SUBLANE)
    else:
        tb = min(tb, B)
        if tb != B:
            tb = _round_up(tb, _SUBLANE)
            if tb >= B:
                tb = B  # full-extent block is always legal
    return tb


def bert_classifier_tuned_forward(inputs, w_hp, b_hp, num_classes, *,
                                  tb=None, force_pallas=False):
    """Pallas forward for BERTClassifierTuned.

    inputs : [B, H]           pooled BERT features ("normalized_output")
    w_hp   : [H, Cp]          prepared (transposed, lane-padded) weight
    b_hp   : [1, Cp]          prepared (lane-padded, f32) bias
    returns: [B, num_classes] float32 logits
    """
    B, H = inputs.shape
    Hw, Cp = w_hp.shape
    assert Hw == H, "weight hidden dim mismatch"

    # Tiny-batch fallback: pallas_call fixed cost (launch + DMA setup, a few
    # microseconds) dwarfs the actual GEMV work -- let XLA fuse it instead.
    if not force_pallas and B <= 256 and H <= 1024:
        logits = jnp.dot(inputs, w_hp[:, :num_classes],
                         preferred_element_type=jnp.float32)
        return logits + b_hp[0, :num_classes]

    tb = _pick_batch_tile(B, tb)
    grid = (pl.cdiv(B, tb),)

    x_bytes = jnp.dtype(inputs.dtype).itemsize
    w_bytes = jnp.dtype(w_hp.dtype).itemsize

    cost = pl.CostEstimate(
        flops=2 * B * H * Cp,
        transcendentals=0,
        bytes_accessed=B * H * x_bytes + H * Cp * w_bytes + Cp * 4 + B * Cp * 4,
    )

    # VMEM budget: double-buffered x tile + double-buffered out tile +
    # single-buffered resident weight/bias.  Only raise the scoped limit when
    # we actually exceed the v5e 16 MiB default (leave headroom elsewhere).
    vmem_needed = (2 * tb * H * x_bytes + 2 * tb * Cp * 4
                   + H * Cp * w_bytes + Cp * 4)
    vmem_limit = None
    if vmem_needed > 12 * 1024 * 1024:
        vmem_limit = int(min(2 * vmem_needed, 100 * 1024 * 1024))

    out_shape = jax.ShapeDtypeStruct((B, Cp), jnp.float32)

    def _build(single_buffer_resident):
        resident_kw = {}
        if single_buffer_resident:
            # Constant index_map across the grid: no need for a 2nd VMEM copy.
            resident_kw = dict(pipeline_mode=pl.Buffered(1))
        return pl.pallas_call(
            _classifier_kernel,
            out_shape=out_shape,
            grid_spec=pltpu.PrefetchScalarGridSpec(
                num_scalar_prefetch=0,
                grid=grid,
                in_specs=[
                    # batch-tiled activation stream
                    pl.BlockSpec((tb, H), lambda i: (i, 0)),
                    # resident weight / bias
                    pl.BlockSpec((H, Cp), lambda i: (0, 0), **resident_kw),
                    pl.BlockSpec((1, Cp), lambda i: (0, 0), **resident_kw),
                ],
                out_specs=pl.BlockSpec((tb, Cp), lambda i: (i, 0)),  # lane-dense
            ),
            compiler_params=pltpu.CompilerParams(
                dimension_semantics=("parallel",),
                vmem_limit_bytes=vmem_limit,
            ),
            cost_estimate=cost,
        )

    try:
        out = _build(single_buffer_resident=True)(inputs, w_hp, b_hp)
    except Exception:
        # Fallback if this runtime rejects buffer_count=1 pipeline_mode.
        out = _build(single_buffer_resident=False)(inputs, w_hp, b_hp)

    # Keep this call inside the caller's jit so the slice fuses downstream.
    return out[:, :num_classes]


def reference_forward(inputs, weight, bias):
    # Pure-JAX reference matching nn.Linear semantics: x @ W.T + b
    return inputs @ weight.T + bias


if __name__ == "__main__":
    key = jax.random.PRNGKey(0)

    # ---- Case A: tiny inference shape -> fused-XLA fallback path ----------
    B0, H0, C0 = 8, 128, 8
    k_x, k_w, k_b, key = (*jax.random.split(key, 3), key)
    x0 = jax.random.normal(k_x, (B0, H0), dtype=jnp.float32)
    w0 = jax.random.normal(k_w, (C0, H0), dtype=jnp.float32) / jnp.sqrt(H0)
    b0 = jax.random.normal(k_b, (C0,), dtype=jnp.float32) * 0.01

    w0_hp, b0_hp, nc0 = prepare_classifier_params(w0, b0)
    y0 = jax.block_until_ready(
        bert_classifier_tuned_forward(x0, w0_hp, b0_hp, nc0))
    ref0 = reference_forward(x0, w0, b0)
    assert y0.shape == (B0, C0)
    assert jnp.allclose(y0, ref0, atol=1e-4, rtol=1e-4), "fallback mismatch"

    # ---- Case B: Pallas path, multi-step grid with a partial last tile ----
    B1, H1, C1 = 160, 256, 10
    k_x, k_w, k_b = jax.random.split(jax.random.PRNGKey(1), 3)
    x1 = jax.random.normal(k_x, (B1, H1), dtype=jnp.float32)
    w1 = jax.random.normal(k_w, (C1, H1), dtype=jnp.float32) / jnp.sqrt(H1)
    b1 = jax.random.normal(k_b, (C1,), dtype=jnp.float32) * 0.01

    w1_hp, b1_hp, nc1 = prepare_classifier_params(w1, b1)
    y1 = jax.block_until_ready(
        bert_classifier_tuned_forward(x1, w1_hp, b1_hp, nc1,
                                      tb=64, force_pallas=True))
    ref1 = reference_forward(x1, w1, b1)
    assert y1.shape == (B1, C1)
    assert jnp.allclose(y1, ref1, atol=1e-4, rtol=1e-4), "pallas f32 mismatch"

    # ---- Case C: bf16 weight (v5e-friendly), in-kernel activation cast ----
    w1_hp16, b1_hp16, _ = prepare_classifier_params(
        w1, b1, compute_dtype=jnp.bfloat16)
    y2 = jax.block_until_ready(
        bert_classifier_tuned_forward(x1, w1_hp16, b1_hp16, nc1,
                                      tb=64, force_pallas=True))
    assert y2.shape == (B1, C1)
    assert jnp.allclose(y2, ref1, atol=5e-2, rtol=5e-2), "pallas bf16 mismatch"

    print("KERNEL_OK")
</pallas_src>

<mosaic_0001>
module attributes {stable_mosaic.version = 11 : i64} {
  func.func @_classifier_kernel(%arg0: i32, %arg1: memref<64x256xf32, #tpu.memory_space<vmem>>, %arg2: memref<256x128xf32, #tpu.memory_space<vmem>>, %arg3: memref<1x128xf32, #tpu.memory_space<vmem>>, %arg4: memref<64x128xf32, #tpu.memory_space<vmem>>) attributes {dimension_semantics = [#tpu.dimension_semantics<parallel>], iteration_bounds = array<i64: 3>, scalar_prefetch = 0 : i64, scratch_operands = 0 : i64, tpu.core_type = #tpu.core_type<tc>, window_params = [{transform_indices = @transform_0, window_bounds = array<i64: 64, 256>}, {pipeline_mode = #tpu.pipeline_mode<synchronous>, transform_indices = @transform_1, window_bounds = array<i64: 256, 128>}, {pipeline_mode = #tpu.pipeline_mode<synchronous>, transform_indices = @transform_2, window_bounds = array<i64: 1, 128>}, {transform_indices = @transform_3, window_bounds = array<i64: 64, 128>}]} {
    %c0 = arith.constant 0 : index
    %c0_0 = arith.constant 0 : index
    %0 = vector.load %arg1[%c0, %c0_0] : memref<64x256xf32, #tpu.memory_space<vmem>>, vector<64x256xf32>
    %c0_1 = arith.constant 0 : index
    %c0_2 = arith.constant 0 : index
    %1 = vector.load %arg2[%c0_1, %c0_2] : memref<256x128xf32, #tpu.memory_space<vmem>>, vector<256x128xf32>
    %cst = arith.constant dense<0.000000e+00> : vector<64x128xf32>
    %2 = tpu.matmul %0, %1, %cst {dimension_numbers = #tpu.dot_dimension_numbers<[1], [0], [0], [1], [0, 0, 1, 1], [], []>} : vector<64x256xf32>, vector<256x128xf32>, vector<64x128xf32> -> vector<64x128xf32>
    %c0_3 = arith.constant 0 : index
    %c0_4 = arith.constant 0 : index
    %3 = vector.load %arg3[%c0_3, %c0_4] : memref<1x128xf32, #tpu.memory_space<vmem>>, vector<1x128xf32>
    %4 = vector.broadcast %3 : vector<1x128xf32> to vector<64x128xf32>
    %5 = arith.addf %2, %4 : vector<64x128xf32>
    %c0_5 = arith.constant 0 : index
    %c0_6 = arith.constant 0 : index
    %6 = vector.load %arg4[%c0_5, %c0_6] : memref<64x128xf32, #tpu.memory_space<vmem>>, vector<64x128xf32>
    tpu.vector_store %arg4[%c0_5, %c0_6], %5 {strides = array<i32>} : memref<64x128xf32, #tpu.memory_space<vmem>>, vector<64x128xf32>,
    return
  }
  func.func @transform_0(%arg0: i32) -> (i32, i32) {
    %c0_i32 = arith.constant 0 : i32
    %c0_i32_0 = arith.constant 0 : i32
    return %arg0, %c0_i32 : i32, i32
  }
  func.func @transform_1(%arg0: i32) -> (i32, i32) {
    %c0_i32 = arith.constant 0 : i32
    %c0_i32_0 = arith.constant 0 : i32
    %c0_i32_1 = arith.constant 0 : i32
    return %c0_i32, %c0_i32_0 : i32, i32
  }
  func.func @transform_2(%arg0: i32) -> (i32, i32) {
    %c0_i32 = arith.constant 0 : i32
    %c0_i32_0 = arith.constant 0 : i32
    %c0_i32_1 = arith.constant 0 : i32
    return %c0_i32, %c0_i32_0 : i32, i32
  }
  func.func @transform_3(%arg0: i32) -> (i32, i32) {
    %c0_i32 = arith.constant 0 : i32
    %c0_i32_0 = arith.constant 0 : i32
    return %arg0, %c0_i32 : i32, i32
  }
}

module attributes {stable_mosaic.version = 11 : i64} {
  func.func @_classifier_kernel(%arg0: i32, %arg1: memref<64x256xf32, #tpu.memory_space<vmem>>, %arg2: memref<256x128xf32, #tpu.memory_space<vmem>>, %arg3: memref<1x128xf32, #tpu.memory_space<vmem>>, %arg4: memref<64x128xf32, #tpu.memory_space<vmem>>) attributes {dimension_semantics = [#tpu.dimension_semantics<parallel>], iteration_bounds = array<i64: 3>, scalar_prefetch = 0 : i64, scratch_operands = 0 : i64, tpu.core_type = #tpu.core_type<tc>, window_params = [{transform_indices = @transform_0, window_bounds = array<i64: 64, 256>}, {pipeline_mode = #tpu.pipeline_mode<synchronous>, transform_indices = @transform_1, window_bounds = array<i64: 256, 128>}, {pipeline_mode = #tpu.pipeline_mode<synchronous>, transform_indices = @transform_2, window_bounds = array<i64: 1, 128>}, {transform_indices = @transform_3, window_bounds = array<i64: 64, 128>}]} {
    %c0 = arith.constant 0 : index
    %c0_0 = arith.constant 0 : index
    %0 = vector.load %arg1[%c0, %c0_0] : memref<64x256xf32, #tpu.memory_space<vmem>>, vector<64x256xf32>
    %c0_1 = arith.constant 0 : index
    %c0_2 = arith.constant 0 : index
    %1 = vector.load %arg2[%c0_1, %c0_2] : memref<256x128xf32, #tpu.memory_space<vmem>>, vector<256x128xf32>
    %cst = arith.constant dense<0.000000e+00> : vector<64x128xf32>
    %2 = tpu.matmul %0, %1, %cst {dimension_numbers = #tpu.dot_dimension_numbers<[1], [0], [0], [1], [0, 0, 1, 1], [], []>} : vector<64x256xf32>, vector<256x128xf32>, vector<64x128xf32> -> vector<64x128xf32>
    %c0_3 = arith.constant 0 : index
    %c0_4 = arith.constant 0 : index
    %3 = vector.load %arg3[%c0_3, %c0_4] : memref<1x128xf32, #tpu.memory_space<vmem>>, vector<1x128xf32>
    %4 = vector.broadcast %3 : vector<1x128xf32> to vector<64x128xf32>
    %5 = arith.addf %2, %4 : vector<64x128xf32>
    %c0_5 = arith.constant 0 : index
    %c0_6 = arith.constant 0 : index
    %6 = vector.load %arg4[%c0_5, %c0_6] : memref<64x128xf32, #tpu.memory_space<vmem>>, vector<64x128xf32>
    tpu.vector_store %arg4[%c0_5, %c0_6], %5 {strides = array<i32>} : memref<64x128xf32, #tpu.memory_space<vmem>>, vector<64x128xf32>,
    return
  }
  func.func @transform_0(%arg0: i32) -> (i32, i32) {
    %c0_i32 = arith.constant 0 : i32
    %c0_i32_0 = arith.constant 0 : i32
    return %arg0, %c0_i32 : i32, i32
  }
  func.func @transform_1(%arg0: i32) -> (i32, i32) {
    %c0_i32 = arith.constant 0 : i32
    %c0_i32_0 = arith.constant 0 : i32
    %c0_i32_1 = arith.constant 0 : i32
    return %c0_i32, %c0_i32_0 : i32, i32
  }
  func.func @transform_2(%arg0: i32) -> (i32, i32) {
    %c0_i32 = arith.constant 0 : i32
    %c0_i32_0 = arith.constant 0 : i32
    %c0_i32_1 = arith.constant 0 : i32
    return %c0_i32, %c0_i32_0 : i32, i32
  }
  func.func @transform_3(%arg0: i32) -> (i32, i32) {
    %c0_i32 = arith.constant 0 : i32
    %c0_i32_0 = arith.constant 0 : i32
    return %arg0, %c0_i32 : i32, i32
  }
}

</mosaic_0001>

<bundles_post_ra>
// kernel: tpu_custom_call.1
= control target key start
LH: loop header
LB: loop body
LE: loop exit
PB: predicated region body
PF: predicated region fallthrough
CT: control target
= control target key end

     0   :  { %8 = vsyncpa [#allocation3], 0  ;;  %s1004_s0 = inlined_call_operand.hbm [shape: f32[160,256], index: 0, kind: input, shape index: {}]   ;;  %s1005_s1 = inlined_call_operand.hbm [shape: f32[256,128], index: 1, kind: input, shape index: {}]   ;;  %s1006_s2 = inlined_call_operand.vmem [shape: f32[1,128], index: 2, kind: input, shape index: {}]   ;;  %s1007_s3 = inlined_call_operand.hbm [shape: f32[160,128], index: 3, kind: output, shape index: {}]  }
   0x1   :  { %10 = vsyncpa [#allocation3 + $0x1], 0 }
   0x2   :  { %11 = vsyncpa [#allocation6], 0 }
   0x3   :  { %12 = vsyncpa [#allocation4], 0 }
   0x4   :  { %14 = vsyncpa [#allocation4 + $0x1], 0  ;;  %s776_s12 = smov 0   ;;  %s778_s13 = smov 0  }
   0x5   :  { %s780_s14 = smov 0   ;;  %s782_s15 = smov 0  }
   0x6 LB: > { %s797_s16 = sadd.s32 4294967295, %s745_s15   ;;  %s476_s17 = sadd.s32 4294967294, %s745_s15   ;;  %s745_s15 = sphi %s782_s15, %s1022_s15   ;;  %s741_s14 = sphi %s780_s14, %s1021_s14   ;;  %s737_s13 = sphi %s778_s13, %s1020_s13   ;;  %s733_s12 = sphi %s776_s12, %s1019_s12  }
   0x7   : > { %s801_s18 = sadd.s32 1, %s745_s15   ;;  %s27_s19 = sadd.s32 1, %s741_s14 }
   0x8   : > { %s24_s20 = ssub.s32 %s745_s15, %s801_s18  ;;  %p34_p0 = scmp.ne.s32.totalorder %s741_s14, %s737_s13 }
   0x9   : > { %p25_p1 = scmp.eq.s32.totalorder %s24_s20, 0  ;;  %p35_p2 = scmp.eq.s32.totalorder %s745_s15, 0 }
   0xa   : > { %p40_p3 = scmp.ne.s32.totalorder %s737_s13, %s733_s12  ;;  %p1008_p4 = scmp.eq.s32.totalorder %s797_s16, 0 }
   0xb   : > { %s813_s21 = scalar_select %p25_p1, %s741_s14, %s27_s19  }
   0xc   : > { %p815_p5 = por %p35_p2, %p34_p0  ;;  %p821_p6 = por %p1008_p4, %p40_p3 }
   0xd   : > { %p106_p7 = scmp.eq.s32.totalorder %s797_s16, 2  ;;  %p112_p8 = scmp.eq.s32.totalorder %s476_s17, 2 }
   0xe   : > { %p477_p9 = scmp.ge.s32.totalorder %s745_s15, 1  ;;  %p119_p10 = scmp.lt.s32.totalorder %s745_s15, 4 }
   0xf   : > { %p828_p11 = por %p106_p7, %p34_p0  ;;  %p832_p12 = por %p112_p8, %p40_p3 }
  0x10   : > { %p836_p13 = pnand %p477_p9, %p119_p10  ;;  %s130_s29 = sshll.u32 %s1005_s1, 4  ;;  %s131_s29 = int_to_ptr.hbm [resolvable:$true] %s130_s29 }
  0x11   : > { %s1012_s25 = scalar_select %p832_p12, 1, 0 }
  0x12   : > { %p544_p1 = pneg %p836_p13  ;;  %s747_s30 = smov [#allocation5]  }
  0x13   : > { %s132_s4 = sshll.u32 %s747_s30, 4  ;;  %s748_s5 = smov 128   ;;  %s133_s4 = int_to_ptr.vmem [resolvable:$true] %s132_s4 }
  0x14   : > { %p545_p0 = pnand %p544_p1, %p1008_p4  ;;  %s749_s6 = smov 8  }
  0x15   : > { %p479_p2 = scmp.ge.s32.totalorder %s745_s15, 3 }
  0x16   : > { %547 = dma.hbm_to_vmem [thread:$0]  (!%p545_p0), %s131_s29, 4096, %s133_s4, [#allocation6], %s748_s5, %s748_s5, %s749_s6  }
  0x17   : > { %145 = sbr.rel (%p479_p2) target bundleno = 64 (0x40), region = 24 }
  0x1c   : > { %148 = sbr.rel (!%p815_p5) target bundleno = 64 (0x40), region = 28  ;;  %s149_s7 = sand.u32 (%p815_p5), 1, %s741_s14  }
  0x1d   : > { %s481_s8 = sshll.u32 (%p815_p5), %s745_s15, 3  ;;  %s480_s9 = sshll.u32 (%p815_p5), %s149_s7, 7 }
  0x1e   : > { %s155_s10 = ssub.s32 (%p815_p5), 20, %s481_s8  ;;  %s855_s20 = scalar_lea.sflag (%p815_p5), [#allocation3], %s149_s7 }
  0x1f   : > { %p156_p3 = scmp.lt.s32.totalorder (%p815_p5), %s155_s10, 8  ;;  %s153_s27 = scalar_lea.vmem (%p815_p5), [#allocation2], %s480_s9 }
  0x21   : > { %s1024_s10 = smov (!%p156_p3, %s155_s10), 8 }
  0x22   : > { %s502_s11 = sshll.u32 %s1024_s10, 4 }
  0x23   : > { %s160_s17 = ssub.s32 128, %s502_s11 }
  0x24   : > { %s161_s19 = sshll.u32 %s160_s17, 4 }
  0x25   : > { %162 = vsyncadd %s855_s20, %s161_s19  ;;  %p858_p5 = scmp.ne.s32.totalorder %s502_s11, 0  ;;  %s504_s28 = sshll.u32 %s745_s15, 7 }
  0x26   : > { %s166_s4 = scalar_lea.hbm %s1004_s0, %s504_s28  ;;  %s866_s5 = sshll.u32 %s153_s27, 4  ;;  %s171_s5 = int_to_ptr.vmem [resolvable:$true] %s866_s5 }
  0x27   : > { %s168_s6 = sshll.u32 %s166_s4, 4  ;;  %s488_s7 = sshll.u32 %s1024_s10, 8  ;;  %s869_s6 = int_to_ptr.hbm [resolvable:$true] %s168_s6 }
  0x28   : > { %s625_s8 = sshra.s32 %s869_s6, 4  ;;  %s627_s9 = sshrl.u32 %s488_s7, 4  ;;  %s626_s8 = int_to_ptr.hbm [resolvable:$true] %s625_s8 }
  0x29   : > { %s632_s11 = scalar_lea.hbm %s626_s8, %s627_s9  ;;  %s636_s27 = scalar_lea.hbm %s1004_s0, 320 }
  0x2a   : > { %p633_p7 = scmp.ne.s32.totalorder %s626_s8, %s632_s11  ;;  %p637_p10 = scmp.lt.s32.totalorder %s626_s8, %s1004_s0 }
  0x2b   : > { %p638_p1 = scmp.lt.s32.totalorder %s636_s27, %s632_s11 }
  0x2c   : > { %p634_p8 = pnand %p633_p7, %p858_p5 }
  0x2d   : > { %p639_p0 = por %p638_p1, %p637_p10 }
  0x2e   : > { %p635_p9 = pneg %p634_p8 }
  0x30   : > { %p640_p2 = pnand %p639_p0, %p635_p9 }
  0x32   : > { %643 = shalt.err (!%p640_p2)
}
  0x33   : > { %s644_s30 = sshra.s32 %s171_s5, 4  ;;  %s750_s17 = smov [#allocation2]   ;;  %s645_s30 = int_to_ptr.vmem [resolvable:$true] %s644_s30 }
  0x34   : > { %s651_s4 = scalar_lea.vmem %s645_s30, %s627_s9  ;;  %s655_s19 = scalar_lea.vmem %s750_s17, 256 }
  0x35   : > { %p652_p3 = scmp.ne.s32.totalorder %s645_s30, %s651_s4  ;;  %p657_p4 = scmp.lt.s32.totalorder %s655_s19, %s651_s4 }
  0x37   : > { %p653_p7 = pnand %p652_p3, %p858_p5 }
  0x39   : > { %p654_p8 = pneg %p653_p7 }
  0x3b   : > { %p659_p12 = pnand %p657_p4, %p654_p8 }
  0x3d   : > { %662 = shalt.err (!%p659_p12)
}
  0x3e   : > { %s751_s8 = smov 256   ;;  %s752_s11 = smov 16  }
  0x3f   : > { %176 = dma.hbm_to_vmem [thread:$0]  (%p858_p5), %s869_s6, %s488_s7, %s171_s5, %s855_s20, %s751_s8, %s751_s8, %s752_s11  }
  0x40 PF: > { %182 = sbr.rel (%p836_p13) target bundleno = 297 (0x129), region = 32  ;;  %s898_s9 = sand.u32 (!%p836_p13), 1, %s737_s13  }
  0x41   : > { %s490_s27 = sshll.u32 (!%p836_p13), %s898_s9, 7  ;;  %s185_s28 = scalar_lea.sflag (!%p836_p13), [#allocation3], %s898_s9 }
  0x42   : > { %s902_s29 = scalar_lea.vmem (!%p836_p13), [#allocation2], %s490_s27 }
  0x45   : > { %720 = dma.done.wait (%p821_p6), %s185_s28, 2048  }
  0x46   : > { %722 = vsyncadd (%p821_p6), %s185_s28, 4294965248  ;;  %p1015_p4 = scmp.eq.s32.totalorder %s797_s16, 0 }
  0x48   : > { %724 = dma.done.wait (%p1015_p4), [#allocation6], 4096   ;;  %p1016_p12 = pmov %p1015_p4 }
  0x49   : > { %v259_v0 = vld [vmem:[#allocation5 + $0x78] sm:$0xff]  ;;  %v258_v1 = vld [vmem:[#allocation5 + $0x70] sm:$0xff]  ;;  %v257_v4 = vld [vmem:[#allocation5 + $0x68] sm:$0xff]  ;;  %s492_s10 = sshll.u32 %s898_s9, 6  ;;  %s371_s22 = scalar_lea.sflag [#allocation4], %s898_s9 }
  0x4a   : > { %726 = vsyncadd (%p1016_p12), [#allocation6], 4294963200  ;;  %v275_v2 = vld [vmem:[#allocation5 + $0xf8] sm:$0xff]  ;;  %506 = vmatpush.msra.mxu2 %v259_v0  ;;  %v274_v3 = vld [vmem:[#allocation5 + $0xf0] sm:$0xff]  ;;  %280 = vmatpush.msra.mxu0 %v259_v0  ;;  %s932_s20 = scalar_lea.vmem [#allocation7], %s492_s10  ;;  %s494_s5 = sshll.u32 (%p828_p11), %s797_s16, 3 }
  0x4b   : > { %522 = vmatpush.msra.mxu3 %v275_v2  ;;  %v273_v5 = vld [vmem:[#allocation5 + $0xe8] sm:$0xff]  ;;  %321 = vmatpush.msra.mxu1 %v275_v2  ;;  %v256_v6 = vld [vmem:[#allocation5 + $0x60] sm:$0xff]  ;;  %v255_v8 = vld [vmem:[#allocation5 + $0x58] sm:$0xff]  ;;  %s379_s6 = ssub.s32 (%p828_p11), 20, %s494_s5 }
  0x4c   : > { %507 = vmatpush.msra.mxu2 %v258_v1  ;;  %281 = vmatpush.msra.mxu0 %v258_v1  ;;  %v272_v7 = vld [vmem:[#allocation5 + $0xe0] sm:$0xff]  ;;  %v271_v9 = vld [vmem:[#allocation5 + $0xd8] sm:$0xff]  ;;  %v254_v10 = vld [vmem:[#allocation5 + $0x50] sm:$0xff]  ;;  %p380_p6 = scmp.lt.s32.totalorder (%p828_p11), %s379_s6, 8 }
  0x4d   : > { %523 = vmatpush.msra.mxu3 %v274_v3  ;;  %322 = vmatpush.msra.mxu1 %v274_v3  ;;  %v270_v11 = vld [vmem:[#allocation5 + $0xd0] sm:$0xff]  ;;  %v253_v12 = vld [vmem:[#allocation5 + $0x48] sm:$0xff]  ;;  %v252_v14 = vld [vmem:[#allocation5 + $0x40] sm:$0xff] }
  0x4e   : > { %508 = vmatpush.msra.mxu2 %v257_v4  ;;  %282 = vmatpush.msra.mxu0 %v257_v4  ;;  %v269_v13 = vld [vmem:[#allocation5 + $0xc8] sm:$0xff]  ;;  %v268_v15 = vld [vmem:[#allocation5 + $0xc0] sm:$0xff]  ;;  %v251_v16 = vld [vmem:[#allocation5 + $0x38] sm:$0xff] }
  0x4f   : > { %524 = vmatpush.msra.mxu3 %v273_v5  ;;  %323 = vmatpush.msra.mxu1 %v273_v5  ;;  %v267_v17 = vld [vmem:[#allocation5 + $0xb8] sm:$0xff]  ;;  %v250_v18 = vld [vmem:[#allocation5 + $0x30] sm:$0xff]  ;;  %v249_v20 = vld [vmem:[#allocation5 + $0x28] sm:$0xff] }
  0x50   : > { %509 = vmatpush.msra.mxu2 %v256_v6  ;;  %283 = vmatpush.msra.mxu0 %v256_v6  ;;  %v266_v19 = vld [vmem:[#allocation5 + $0xb0] sm:$0xff]  ;;  %v265_v21 = vld [vmem:[#allocation5 + $0xa8] sm:$0xff]  ;;  %v248_v22 = vld [vmem:[#allocation5 + $0x20] sm:$0xff] }
  0x51   : > { %525 = vmatpush.msra.mxu3 %v272_v7  ;;  %324 = vmatpush.msra.mxu1 %v272_v7  ;;  %v264_v23 = vld [vmem:[#allocation5 + $0xa0] sm:$0xff]  ;;  %v247_v24 = vld [vmem:[#allocation5 + $0x18] sm:$0xff]  ;;  %v246_v26 = vld [vmem:[#allocation5 + $0x10] sm:$0xff] }
  0x52   : > { %510 = vmatpush.msra.mxu2 %v255_v8  ;;  %284 = vmatpush.msra.mxu0 %v255_v8  ;;  %v263_v25 = vld [vmem:[#allocation5 + $0x98] sm:$0xff]  ;;  %v262_v27 = vld [vmem:[#allocation5 + $0x90] sm:$0xff]  ;;  %v245_v28 = vld [vmem:[#allocation5 + $0x8] sm:$0xff] }
  0x53   : > { %526 = vmatpush.msra.mxu3 %v271_v9  ;;  %325 = vmatpush.msra.mxu1 %v271_v9  ;;  %v261_v29 = vld [vmem:[#allocation5 + $0x88] sm:$0xff]  ;;  %v244_v30 = vld [vmem:[#allocation5] sm:$0xff]  ;;  %v238_v36 = vld [vmem:[%s902_s29 + $0x50] sm:$0xff] }
  0x54   : > { %511 = vmatpush.msra.mxu2 %v254_v10  ;;  %285 = vmatpush.msra.mxu0 %v254_v10  ;;  %v260_v31 = vld [vmem:[#allocation5 + $0x80] sm:$0xff]  ;;  %v237_v33 = vld [vmem:[%s902_s29 + $0x48] sm:$0xff]  ;;  %v239_v37 = vld [vmem:[%s902_s29 + $0x58] sm:$0xff] }
  0x55   : > { %527 = vmatpush.msra.mxu3 %v270_v11  ;;  %326 = vmatpush.msra.mxu1 %v270_v11  ;;  %v236_v32 = vld [vmem:[%s902_s29 + $0x40] sm:$0xff]  ;;  %v229_v35 = vld [vmem:[%s902_s29 + $0x8] sm:$0xff]  ;;  %v230_v38 = vld [vmem:[%s902_s29 + $0x10] sm:$0xff] }
  0x56   : > { %512 = vmatpush.msra.mxu2 %v253_v12  ;;  %286 = vmatpush.msra.mxu0 %v253_v12  ;;  %v228_v34 = vld [vmem:[%s902_s29] sm:$0xff]  ;;  %v231_v39 = vld [vmem:[%s902_s29 + $0x18] sm:$0xff]  ;;  %v241_v41 = vld [vmem:[%s902_s29 + $0x68] sm:$0xff] }
  0x57   : > { %528 = vmatpush.msra.mxu3 %v269_v13  ;;  %327 = vmatpush.msra.mxu1 %v269_v13  ;;  %v240_v40 = vld [vmem:[%s902_s29 + $0x60] sm:$0xff]  ;;  %v233_v43 = vld [vmem:[%s902_s29 + $0x28] sm:$0xff]  ;;  %v242_v44 = vld [vmem:[%s902_s29 + $0x70] sm:$0xff] }
  0x58   : > { %513 = vmatpush.msra.mxu2 %v252_v14  ;;  %287 = vmatpush.msra.mxu0 %v252_v14  ;;  %v232_v42 = vld [vmem:[%s902_s29 + $0x20] sm:$0xff]  ;;  %v243_v45 = vld [vmem:[%s902_s29 + $0x78] sm:$0xff]  ;;  %v234_v46 = vld [vmem:[%s902_s29 + $0x30] sm:$0xff] }
  0x59   : > { %529 = vmatpush.msra.mxu3 %v268_v15  ;;  %328 = vmatpush.msra.mxu1 %v268_v15  ;;  %v235_v47 = vld [vmem:[%s902_s29 + $0x38] sm:$0xff]  ;;  %v594_v48 = vld [vmem:[%s1006_s2] ss:$0 sm:$0xff] }
  0x5a   : > { %514 = vmatpush.msra.mxu2 %v251_v16  ;;  %288 = vmatpush.msra.mxu0 %v251_v16 }
  0x5b   : > { %530 = vmatpush.msra.mxu3 %v267_v17  ;;  %329 = vmatpush.msra.mxu1 %v267_v17 }
  0x5c   : > { %515 = vmatpush.msra.mxu2 %v250_v18  ;;  %289 = vmatpush.msra.mxu0 %v250_v18 }
  0x5d   : > { %531 = vmatpush.msra.mxu3 %v266_v19  ;;  %330 = vmatpush.msra.mxu1 %v266_v19 }
  0x5e   : > { %516 = vmatpush.msra.mxu2 %v249_v20  ;;  %290 = vmatpush.msra.mxu0 %v249_v20 }
  0x5f   : > { %532 = vmatpush.msra.mxu3 %v265_v21  ;;  %331 = vmatpush.msra.mxu1 %v265_v21 }
  0x60   : > { %517 = vmatpush.msra.mxu2 %v248_v22  ;;  %291 = vmatpush.msra.mxu0 %v248_v22 }
  0x61   : > { %533 = vmatpush.msra.mxu3 %v264_v23  ;;  %332 = vmatpush.msra.mxu1 %v264_v23 }
  0x62   : > { %518 = vmatpush.msra.mxu2 %v247_v24  ;;  %292 = vmatpush.msra.mxu0 %v247_v24 }
  0x63   : > { %534 = vmatpush.msra.mxu3 %v263_v25  ;;  %333 = vmatpush.msra.mxu1 %v263_v25 }
  0x64   : > { %519 = vmatpush.msra.mxu2 %v246_v26  ;;  %293 = vmatpush.msra.mxu0 %v246_v26 }
  0x65   : > { %535 = vmatpush.msra.mxu3 %v262_v27  ;;  %334 = vmatpush.msra.mxu1 %v262_v27 }
  0x66   : > { %520 = vmatpush.msra.mxu2 %v245_v28  ;;  %294 = vmatpush.msra.mxu0 %v245_v28 }
  0x67   : > { %536 = vmatpush.msra.mxu3 %v261_v29  ;;  %335 = vmatpush.msra.mxu1 %v261_v29 }
  0x68   : > { %521 = vmatpush.msra.mxu2 %v244_v30  ;;  %295 = vmatpush.msra.mxu0 %v244_v30 }
  0x69   : > { %537 = vmatpush.msra.mxu3 %v260_v31  ;;  %308 = vmatmul.f32.vlgmr.msra.gmra.mxu2 %v236_v32 }
  0x6a   : > { %349 = vmatmul.f32.vlgmr.msra.gmra.mxu3 %v237_v33  ;;  %336 = vmatpush.msra.mxu1 %v260_v31 }
  0x6b   : > { %296 = vmatmul.f32.vlgmr.msra.gmra.mxu0 %v228_v34  ;;  %337 = vmatmul.f32.vlgmr.msra.gmra.mxu1 %v229_v35 }
  0x71   : > { %311 = vmatmul.f32.gmra.mxu2 %v238_v36 }
  0x72   : > { %352 = vmatmul.f32.gmra.mxu3 %v239_v37 }
  0x73   : > { %299 = vmatmul.f32.gmra.mxu0 %v230_v38  ;;  %340 = vmatmul.f32.gmra.mxu1 %v231_v39 }
  0x79   : > { %314 = vmatmul.f32.gmra.mxu2 %v240_v40 }
  0x7a   : > { %355 = vmatmul.f32.gmra.mxu3 %v241_v41 }
  0x7b   : > { %302 = vmatmul.f32.gmra.mxu0 %v232_v42  ;;  %343 = vmatmul.f32.gmra.mxu1 %v233_v43 }
  0x81   : > { %317 = vmatmul.f32.gmra.mxu2 %v242_v44 }
  0x82   : > { %358 = vmatmul.f32.gmra.mxu3 %v243_v45 }
  0x83   : > { %305 = vmatmul.f32.gmra.mxu0 %v234_v46  ;;  %346 = vmatmul.f32.gmra.mxu1 %v235_v47 }
  0xe8   : > { %v297_v49 = vpop.f32.mrf.mxu0  ;;  %v338_v50 = vpop.f32.mrf.mxu1 }
  0xe9   : > { %v298_v51 = vadd.f32 %v594_v48, %v297_v49 }
  0xeb   : > { %v339_v52 = vadd.f32 %v338_v50, %v298_v51 }
  0xec   : > { %v309_v53 = vpop.f32.mrf.mxu2 }
  0xed   : > { %v350_v54 = vpop.f32.mrf.mxu3  ;;  %v310_v55 = vadd.f32 %v594_v48, %v309_v53  ;;  %362 = vst [vmem:[%s932_s20] sm:$0xff] %v339_v52 }
  0xef   : > { %v351_v56 = vadd.f32 %v350_v54, %v310_v55 }
  0xf0   : > { %v300_v57 = vpop.f32.mrf.mxu0  ;;  %v341_v58 = vpop.f32.mrf.mxu1 }
  0xf1   : > { %366 = vst [vmem:[%s932_s20 + $0x20] sm:$0xff] %v351_v56  ;;  %v301_v59 = vadd.f32 %v594_v48, %v300_v57 }
  0xf3   : > { %v342_v60 = vadd.f32 %v341_v58, %v301_v59 }
  0xf4   : > { %v312_v61 = vpop.f32.mrf.mxu2 }
  0xf5   : > { %v353_v62 = vpop.f32.mrf.mxu3  ;;  %v313_v63 = vadd.f32 %v594_v48, %v312_v61  ;;  %363 = vst [vmem:[%s932_s20 + $0x8] sm:$0xff] %v342_v60 }
  0xf7   : > { %v354_v0 = vadd.f32 %v353_v62, %v313_v63 }
  0xf8   : > { %v303_v1 = vpop.f32.mrf.mxu0  ;;  %v344_v2 = vpop.f32.mrf.mxu1 }
  0xf9   : > { %367 = vst [vmem:[%s932_s20 + $0x28] sm:$0xff] %v354_v0  ;;  %v304_v3 = vadd.f32 %v594_v48, %v303_v1 }
  0xfb   : > { %v345_v4 = vadd.f32 %v344_v2, %v304_v3 }
  0xfc   : > { %v315_v5 = vpop.f32.mrf.mxu2 }
  0xfd   : > { %v356_v6 = vpop.f32.mrf.mxu3  ;;  %v316_v7 = vadd.f32 %v594_v48, %v315_v5  ;;  %364 = vst [vmem:[%s932_s20 + $0x10] sm:$0xff] %v345_v4 }
  0xff   : > { %v357_v8 = vadd.f32 %v356_v6, %v316_v7 }
 0x100   : > { %v306_v9 = vpop.f32.mrf.mxu0  ;;  %v347_v10 = vpop.f32.mrf.mxu1 }
 0x101   : > { %368 = vst [vmem:[%s932_s20 + $0x30] sm:$0xff] %v357_v8  ;;  %v307_v11 = vadd.f32 %v594_v48, %v306_v9 }
 0x103   : > { %v348_v12 = vadd.f32 %v347_v10, %v307_v11 }
 0x104   : > { %v318_v13 = vpop.f32.mrf.mxu2 }
 0x105   : > { %v359_v14 = vpop.f32.mrf.mxu3  ;;  %v319_v15 = vadd.f32 %v594_v48, %v318_v13  ;;  %365 = vst [vmem:[%s932_s20 + $0x18] sm:$0xff] %v348_v12  ;;  %377 = sbr.rel (!%p828_p11) target bundleno = 297 (0x129), region = 44 }
 0x107   : > { %v360_v16 = vadd.f32 %v359_v14, %v319_v15 }
 0x109   : > { %369 = vst [vmem:[%s932_s20 + $0x38] sm:$0xff] %v360_v16 }
 0x10a   : > { %s1026_s6 = smov (!%p380_p6, %s379_s6), 8 }
 0x10b   : > { %s495_s7 = sshll.u32 %s1026_s6, 3 }
 0x10c   : > { %s383_s30 = ssub.s32 64, %s495_s7 }
 0x10d   : > { %s384_s4 = sshll.u32 %s383_s30, 4 }
 0x10e   : > { %385 = vsyncadd %s371_s22, %s384_s4  ;;  %p951_p13 = scmp.ne.s32.totalorder %s495_s7, 0  ;;  %s505_s17 = sshll.u32 %s797_s16, 6 }
 0x10f   : > { %s388_s11 = scalar_lea.hbm %s1007_s3, %s505_s17  ;;  %s390_s27 = sshll.u32 %s932_s20, 4  ;;  %s960_s27 = int_to_ptr.vmem [resolvable:$true] %s390_s27 }
 0x110   : > { %s392_s28 = sshll.u32 %s388_s11, 4  ;;  %s499_s29 = sshll.u32 %s1026_s6, 7  ;;  %s962_s28 = int_to_ptr.hbm [resolvable:$true] %s392_s28 }
 0x111   : > { %s664_s23 = sshra.s32 %s960_s27, 4  ;;  %s666_s26 = sshrl.u32 %s499_s29, 4  ;;  %s665_s23 = int_to_ptr.vmem [resolvable:$true] %s664_s23 }
 0x112   : > { %s671_s10 = scalar_lea.vmem %s665_s23, %s666_s26  ;;  %s753_s16 = smov [#allocation7]  }
 0x113   : > { %p672_p11 = scmp.ne.s32.totalorder %s665_s23, %s671_s10  ;;  %s675_s5 = scalar_lea.vmem %s753_s16, 128 }
 0x114   : > { %p677_p10 = scmp.lt.s32.totalorder %s675_s5, %s671_s10 }
 0x115   : > { %p673_p5 = pnand %p672_p11, %p951_p13 }
 0x117   : > { %p674_p9 = pneg %p673_p5 }
 0x119   : > { %p679_p1 = pnand %p677_p10, %p674_p9 }
 0x11b   : > { %682 = shalt.err (!%p679_p1)
}
 0x11c   : > { %s683_s20 = sshra.s32 %s962_s28, 4  ;;  %s694_s17 = scalar_lea.hbm %s1007_s3, 160  ;;  %s684_s20 = int_to_ptr.hbm [resolvable:$true] %s683_s20 }
 0x11d   : > { %s690_s7 = scalar_lea.hbm %s684_s20, %s666_s26  ;;  %p695_p7 = scmp.lt.s32.totalorder %s684_s20, %s1007_s3 }
 0x11e   : > { %p691_p0 = scmp.ne.s32.totalorder %s684_s20, %s690_s7  ;;  %p696_p8 = scmp.lt.s32.totalorder %s694_s17, %s690_s7 }
 0x120   : > { %p692_p2 = pnand %p691_p0, %p951_p13  ;;  %p697_p4 = por %p696_p8, %p695_p7 }
 0x122   : > { %p693_p3 = pneg %p692_p2 }
 0x124   : > { %p698_p12 = pnand %p697_p4, %p693_p3 }
 0x126   : > { %701 = shalt.err (!%p698_p12)
}
 0x127   : > { %s754_s11 = smov 128   ;;  %s755_s23 = smov 8  }
 0x128   : > { %398 = dma.vmem_to_hbm [thread:$0]  (%p951_p13), %s960_s27, %s499_s29, %s962_s28, %s371_s22, %s754_s11, %s754_s11, %s755_s23  }
 0x129 PF: > { %p554_p6 = scmp.ge.s32.totalorder %s745_s15, 2  ;;  %s407_s26 = sand.u32 1, %s733_s12  }
 0x12a   : > { %p1018_p11 = scmp.ne.s32.totalorder %s1012_s25, 0  ;;  %s408_s10 = scalar_lea.sflag [#allocation4], %s407_s26 }
 0x12c   : > { %p549_p5 = pnand %p554_p6, %p1018_p11 }
 0x12e   : > { %p550_p9 = pneg %p549_p5 }
 0x130   : > { %728 = dma.done.wait (%p550_p9), %s408_s10, 1024  }
 0x131   : > { %730 = vsyncadd (%p550_p9), %s408_s10, 4294966272  ;;  %p17_p10 = scmp.ge.s32.totalorder %s801_s18, 5   ;;  %s1019_s12 = smov %s737_s13 }
 0x132   : > { %s1020_s13 = smov %s741_s14  ;;  %s1021_s14 = smov %s813_s21 }
 0x133   : > { %s1022_s15 = smov %s801_s18  ;;  %19 = sbr.rel (!%p17_p10) target bundleno = 6 (0x6), region = 81 }
 0x138   :  { %414 = vsyncpa [#allocation3], 1 }
 0x139   :  { %416 = vsyncpa [#allocation3 + $0x1], 1 }
 0x13a   :  { %417 = vsyncpa [#allocation6], 1 }
 0x13b   :  { %418 = vsyncpa [#allocation4], 1 }
 0x13c   :  { %420 = vsyncpa [#allocation4 + $0x1], 1 }

// kernel: tpu_custom_call.1
= control target key start
LH: loop header
LB: loop body
LE: loop exit
PB: predicated region body
PF: predicated region fallthrough
CT: control target
= control target key end

     0   :  { %8 = vsyncpa [#allocation3], 0  ;;  %s1004_s0 = inlined_call_operand.hbm [shape: f32[160,256], index: 0, kind: input, shape index: {}]   ;;  %s1005_s1 = inlined_call_operand.hbm [shape: f32[256,128], index: 1, kind: input, shape index: {}]   ;;  %s1006_s2 = inlined_call_operand.vmem [shape: f32[1,128], index: 2, kind: input, shape index: {}]   ;;  %s1007_s3 = inlined_call_operand.hbm [shape: f32[160,128], index: 3, kind: output, shape index: {}]  }
   0x1   :  { %10 = vsyncpa [#allocation3 + $0x1], 0 }
   0x2   :  { %11 = vsyncpa [#allocation6], 0 }
   0x3   :  { %12 = vsyncpa [#allocation4], 0 }
   0x4   :  { %14 = vsyncpa [#allocation4 + $0x1], 0  ;;  %s776_s12 = smov 0   ;;  %s778_s13 = smov 0  }
   0x5   :  { %s780_s14 = smov 0   ;;  %s782_s15 = smov 0  }
   0x6 LB: > { %s797_s16 = sadd.s32 4294967295, %s745_s15   ;;  %s476_s17 = sadd.s32 4294967294, %s745_s15   ;;  %s745_s15 = sphi %s782_s15, %s1022_s15   ;;  %s741_s14 = sphi %s780_s14, %s1021_s14   ;;  %s737_s13 = sphi %s778_s13, %s1020_s13   ;;  %s733_s12 = sphi %s776_s12, %s1019_s12  }
   0x7   : > { %s801_s18 = sadd.s32 1, %s745_s15   ;;  %s27_s19 = sadd.s32 1, %s741_s14 }
   0x8   : > { %s24_s20 = ssub.s32 %s745_s15, %s801_s18  ;;  %p34_p0 = scmp.ne.s32.totalorder %s741_s14, %s737_s13 }
   0x9   : > { %p25_p1 = scmp.eq.s32.totalorder %s24_s20, 0  ;;  %p35_p2 = scmp.eq.s32.totalorder %s745_s15, 0 }
   0xa   : > { %p40_p3 = scmp.ne.s32.totalorder %s737_s13, %s733_s12  ;;  %p1008_p4 = scmp.eq.s32.totalorder %s797_s16, 0 }
   0xb   : > { %s813_s21 = scalar_select %p25_p1, %s741_s14, %s27_s19  }
   0xc   : > { %p815_p5 = por %p35_p2, %p34_p0  ;;  %p821_p6 = por %p1008_p4, %p40_p3 }
   0xd   : > { %p106_p7 = scmp.eq.s32.totalorder %s797_s16, 2  ;;  %p112_p8 = scmp.eq.s32.totalorder %s476_s17, 2 }
   0xe   : > { %p477_p9 = scmp.ge.s32.totalorder %s745_s15, 1  ;;  %p119_p10 = scmp.lt.s32.totalorder %s745_s15, 4 }
   0xf   : > { %p828_p11 = por %p106_p7, %p34_p0  ;;  %p832_p12 = por %p112_p8, %p40_p3 }
  0x10   : > { %p836_p13 = pnand %p477_p9, %p119_p10  ;;  %s130_s29 = sshll.u32 %s1005_s1, 4  ;;  %s131_s29 = int_to_ptr.hbm [resolvable:$true] %s130_s29 }
  0x11   : > { %s1012_s25 = scalar_select %p832_p12, 1, 0 }
  0x12   : > { %p544_p1 = pneg %p836_p13  ;;  %s747_s30 = smov [#allocation5]  }
  0x13   : > { %s132_s4 = sshll.u32 %s747_s30, 4  ;;  %s748_s5 = smov 128   ;;  %s133_s4 = int_to_ptr.vmem [resolvable:$true] %s132_s4 }
  0x14   : > { %p545_p0 = pnand %p544_p1, %p1008_p4  ;;  %s749_s6 = smov 8  }
  0x15   : > { %p479_p2 = scmp.ge.s32.totalorder %s745_s15, 3 }
  0x16   : > { %547 = dma.hbm_to_vmem [thread:$0]  (!%p545_p0), %s131_s29, 4096, %s133_s4, [#allocation6], %s748_s5, %s748_s5, %s749_s6  }
  0x17   : > { %145 = sbr.rel (%p479_p2) target bundleno = 64 (0x40), region = 24 }
  0x1c   : > { %148 = sbr.rel (!%p815_p5) target bundleno = 64 (0x40), region = 28  ;;  %s149_s7 = sand.u32 (%p815_p5), 1, %s741_s14  }
  0x1d   : > { %s481_s8 = sshll.u32 (%p815_p5), %s745_s15, 3  ;;  %s480_s9 = sshll.u32 (%p815_p5), %s149_s7, 7 }
  0x1e   : > { %s155_s10 = ssub.s32 (%p815_p5), 20, %s481_s8  ;;  %s855_s20 = scalar_lea.sflag (%p815_p5), [#allocation3], %s149_s7 }
  0x1f   : > { %p156_p3 = scmp.lt.s32.totalorder (%p815_p5), %s155_s10, 8  ;;  %s153_s27 = scalar_lea.vmem (%p815_p5), [#allocation2], %s480_s9 }
  0x21   : > { %s1024_s10 = smov (!%p156_p3, %s155_s10), 8 }
  0x22   : > { %s502_s11 = sshll.u32 %s1024_s10, 4 }
  0x23   : > { %s160_s17 = ssub.s32 128, %s502_s11 }
  0x24   : > { %s161_s19 = sshll.u32 %s160_s17, 4 }
  0x25   : > { %162 = vsyncadd %s855_s20, %s161_s19  ;;  %p858_p5 = scmp.ne.s32.totalorder %s502_s11, 0  ;;  %s504_s28 = sshll.u32 %s745_s15, 7 }
  0x26   : > { %s166_s4 = scalar_lea.hbm %s1004_s0, %s504_s28  ;;  %s866_s5 = sshll.u32 %s153_s27, 4  ;;  %s171_s5 = int_to_ptr.vmem [resolvable:$true] %s866_s5 }
  0x27   : > { %s168_s6 = sshll.u32 %s166_s4, 4  ;;  %s488_s7 = sshll.u32 %s1024_s10, 8  ;;  %s869_s6 = int_to_ptr.hbm [resolvable:$true] %s168_s6 }
  0x28   : > { %s625_s8 = sshra.s32 %s869_s6, 4  ;;  %s627_s9 = sshrl.u32 %s488_s7, 4  ;;  %s626_s8 = int_to_ptr.hbm [resolvable:$true] %s625_s8 }
  0x29   : > { %s632_s11 = scalar_lea.hbm %s626_s8, %s627_s9  ;;  %s636_s27 = scalar_lea.hbm %s1004_s0, 320 }
  0x2a   : > { %p633_p7 = scmp.ne.s32.totalorder %s626_s8, %s632_s11  ;;  %p637_p10 = scmp.lt.s32.totalorder %s626_s8, %s1004_s0 }
  0x2b   : > { %p638_p1 = scmp.lt.s32.totalorder %s636_s27, %s632_s11 }
  0x2c   : > { %p634_p8 = pnand %p633_p7, %p858_p5 }
  0x2d   : > { %p639_p0 = por %p638_p1, %p637_p10 }
  0x2e   : > { %p635_p9 = pneg %p634_p8 }
  0x30   : > { %p640_p2 = pnand %p639_p0, %p635_p9 }
  0x32   : > { %643 = shalt.err (!%p640_p2)
}
  0x33   : > { %s644_s30 = sshra.s32 %s171_s5, 4  ;;  %s750_s17 = smov [#allocation2]   ;;  %s645_s30 = int_to_ptr.vmem [resolvable:$true] %s644_s30 }
  0x34   : > { %s651_s4 = scalar_lea.vmem %s645_s30, %s627_s9  ;;  %s655_s19 = scalar_lea.vmem %s750_s17, 256 }
  0x35   : > { %p652_p3 = scmp.ne.s32.totalorder %s645_s30, %s651_s4  ;;  %p657_p4 = scmp.lt.s32.totalorder %s655_s19, %s651_s4 }
  0x37   : > { %p653_p7 = pnand %p652_p3, %p858_p5 }
  0x39   : > { %p654_p8 = pneg %p653_p7 }
  0x3b   : > { %p659_p12 = pnand %p657_p4, %p654_p8 }
  0x3d   : > { %662 = shalt.err (!%p659_p12)
}
  0x3e   : > { %s751_s8 = smov 256   ;;  %s752_s11 = smov 16  }
  0x3f   : > { %176 = dma.hbm_to_vmem [thread:$0]  (%p858_p5), %s869_s6, %s488_s7, %s171_s5, %s855_s20, %s751_s8, %s751_s8, %s752_s11  }
  0x40 PF: > { %182 = sbr.rel (%p836_p13) target bundleno = 297 (0x129), region = 32  ;;  %s898_s9 = sand.u32 (!%p836_p13), 1, %s737_s13  }
  0x41   : > { %s490_s27 = sshll.u32 (!%p836_p13), %s898_s9, 7  ;;  %s185_s28 = scalar_lea.sflag (!%p836_p13), [#allocation3], %s898_s9 }
  0x42   : > { %s902_s29 = scalar_lea.vmem (!%p836_p13), [#allocation2], %s490_s27 }
  0x45   : > { %720 = dma.done.wait (%p821_p6), %s185_s28, 2048  }
  0x46   : > { %722 = vsyncadd (%p821_p6), %s185_s28, 4294965248  ;;  %p1015_p4 = scmp.eq.s32.totalorder %s797_s16, 0 }
  0x48   : > { %724 = dma.done.wait (%p1015_p4), [#allocation6], 4096   ;;  %p1016_p12 = pmov %p1015_p4 }
  0x49   : > { %v259_v0 = vld [vmem:[#allocation5 + $0x78] sm:$0xff]  ;;  %v258_v1 = vld [vmem:[#allocation5 + $0x70] sm:$0xff]  ;;  %v257_v4 = vld [vmem:[#allocation5 + $0x68] sm:$0xff]  ;;  %s492_s10 = sshll.u32 %s898_s9, 6  ;;  %s371_s22 = scalar_lea.sflag [#allocation4], %s898_s9 }
  0x4a   : > { %726 = vsyncadd (%p1016_p12), [#allocation6], 4294963200  ;;  %v275_v2 = vld [vmem:[#allocation5 + $0xf8] sm:$0xff]  ;;  %506 = vmatpush.msra.mxu2 %v259_v0  ;;  %v274_v3 = vld [vmem:[#allocation5 + $0xf0] sm:$0xff]  ;;  %280 = vmatpush.msra.mxu0 %v259_v0  ;;  %s932_s20 = scalar_lea.vmem [#allocation7], %s492_s10  ;;  %s494_s5 = sshll.u32 (%p828_p11), %s797_s16, 3 }
  0x4b   : > { %522 = vmatpush.msra.mxu3 %v275_v2  ;;  %v273_v5 = vld [vmem:[#allocation5 + $0xe8] sm:$0xff]  ;;  %321 = vmatpush.msra.mxu1 %v275_v2  ;;  %v256_v6 = vld [vmem:[#allocation5 + $0x60] sm:$0xff]  ;;  %v255_v8 = vld [vmem:[#allocation5 + $0x58] sm:$0xff]  ;;  %s379_s6 = ssub.s32 (%p828_p11), 20, %s494_s5 }
  0x4c   : > { %507 = vmatpush.msra.mxu2 %v258_v1  ;;  %281 = vmatpush.msra.mxu0 %v258_v1  ;;  %v272_v7 = vld [vmem:[#allocation5 + $0xe0] sm:$0xff]  ;;  %v271_v9 = vld [vmem:[#allocation5 + $0xd8] sm:$0xff]  ;;  %v254_v10 = vld [vmem:[#allocation5 + $0x50] sm:$0xff]  ;;  %p380_p6 = scmp.lt.s32.totalorder (%p828_p11), %s379_s6, 8 }
  0x4d   : > { %523 = vmatpush.msra.mxu3 %v274_v3  ;;  %322 = vmatpush.msra.mxu1 %v274_v3  ;;  %v270_v11 = vld [vmem:[#allocation5 + $0xd0] sm:$0xff]  ;;  %v253_v12 = vld [vmem:[#allocation5 + $0x48] sm:$0xff]  ;;  %v252_v14 = vld [vmem:[#allocation5 + $0x40] sm:$0xff] }
  0x4e   : > { %508 = vmatpush.msra.mxu2 %v257_v4  ;;  %282 = vmatpush.msra.mxu0 %v257_v4  ;;  %v269_v13 = vld [vmem:[#allocation5 + $0xc8] sm:$0xff]  ;;  %v268_v15 = vld [vmem:[#allocation5 + $0xc0] sm:$0xff]  ;;  %v251_v16 = vld [vmem:[#allocation5 + $0x38] sm:$0xff] }
  0x4f   : > { %524 = vmatpush.msra.mxu3 %v273_v5  ;;  %323 = vmatpush.msra.mxu1 %v273_v5  ;;  %v267_v17 = vld [vmem:[#allocation5 + $0xb8] sm:$0xff]  ;;  %v250_v18 = vld [vmem:[#allocation5 + $0x30] sm:$0xff]  ;;  %v249_v20 = vld [vmem:[#allocation5 + $0x28] sm:$0xff] }
  0x50   : > { %509 = vmatpush.msra.mxu2 %v256_v6  ;;  %283 = vmatpush.msra.mxu0 %v256_v6  ;;  %v266_v19 = vld [vmem:[#allocation5 + $0xb0] sm:$0xff]  ;;  %v265_v21 = vld [vmem:[#allocation5 + $0xa8] sm:$0xff]  ;;  %v248_v22 = vld [vmem:[#allocation5 + $0x20] sm:$0xff] }
  0x51   : > { %525 = vmatpush.msra.mxu3 %v272_v7  ;;  %324 = vmatpush.msra.mxu1 %v272_v7  ;;  %v264_v23 = vld [vmem:[#allocation5 + $0xa0] sm:$0xff]  ;;  %v247_v24 = vld [vmem:[#allocation5 + $0x18] sm:$0xff]  ;;  %v246_v26 = vld [vmem:[#allocation5 + $0x10] sm:$0xff] }
  0x52   : > { %510 = vmatpush.msra.mxu2 %v255_v8  ;;  %284 = vmatpush.msra.mxu0 %v255_v8  ;;  %v263_v25 = vld [vmem:[#allocation5 + $0x98] sm:$0xff]  ;;  %v262_v27 = vld [vmem:[#allocation5 + $0x90] sm:$0xff]  ;;  %v245_v28 = vld [vmem:[#allocation5 + $0x8] sm:$0xff] }
  0x53   : > { %526 = vmatpush.msra.mxu3 %v271_v9  ;;  %325 = vmatpush.msra.mxu1 %v271_v9  ;;  %v261_v29 = vld [vmem:[#allocation5 + $0x88] sm:$0xff]  ;;  %v244_v30 = vld [vmem:[#allocation5] sm:$0xff]  ;;  %v238_v36 = vld [vmem:[%s902_s29 + $0x50] sm:$0xff] }
  0x54   : > { %511 = vmatpush.msra.mxu2 %v254_v10  ;;  %285 = vmatpush.msra.mxu0 %v254_v10  ;;  %v260_v31 = vld [vmem:[#allocation5 + $0x80] sm:$0xff]  ;;  %v237_v33 = vld [vmem:[%s902_s29 + $0x48] sm:$0xff]  ;;  %v239_v37 = vld [vmem:[%s902_s29 + $0x58] sm:$0xff] }
  0x55   : > { %527 = vmatpush.msra.mxu3 %v270_v11  ;;  %326 = vmatpush.msra.mxu1 %v270_v11  ;;  %v236_v32 = vld [vmem:[%s902_s29 + $0x40] sm:$0xff]  ;;  %v229_v35 = vld [vmem:[%s902_s29 + $0x8] sm:$0xff]  ;;  %v230_v38 = vld [vmem:[%s902_s29 + $0x10] sm:$0xff] }
  0x56   : > { %512 = vmatpush.msra.mxu2 %v253_v12  ;;  %286 = vmatpush.msra.mxu0 %v253_v12  ;;  %v228_v34 = vld [vmem:[%s902_s29] sm:$0xff]  ;;  %v231_v39 = vld [vmem:[%s902_s29 + $0x18] sm:$0xff]  ;;  %v241_v41 = vld [vmem:[%s902_s29 + $0x68] sm:$0xff] }
  0x57   : > { %528 = vmatpush.msra.mxu3 %v269_v13  ;;  %327 = vmatpush.msra.mxu1 %v269_v13  ;;  %v240_v40 = vld [vmem:[%s902_s29 + $0x60] sm:$0xff]  ;;  %v233_v43 = vld [vmem:[%s902_s29 + $0x28] sm:$0xff]  ;;  %v242_v44 = vld [vmem:[%s902_s29 + $0x70] sm:$0xff] }
  0x58   : > { %513 = vmatpush.msra.mxu2 %v252_v14  ;;  %287 = vmatpush.msra.mxu0 %v252_v14  ;;  %v232_v42 = vld [vmem:[%s902_s29 + $0x20] sm:$0xff]  ;;  %v243_v45 = vld [vmem:[%s902_s29 + $0x78] sm:$0xff]  ;;  %v234_v46 = vld [vmem:[%s902_s29 + $0x30] sm:$0xff] }
  0x59   : > { %529 = vmatpush.msra.mxu3 %v268_v15  ;;  %328 = vmatpush.msra.mxu1 %v268_v15  ;;  %v235_v47 = vld [vmem:[%s902_s29 + $0x38] sm:$0xff]  ;;  %v594_v48 = vld [vmem:[%s1006_s2] ss:$0 sm:$0xff] }
  0x5a   : > { %514 = vmatpush.msra.mxu2 %v251_v16  ;;  %288 = vmatpush.msra.mxu0 %v251_v16 }
  0x5b   : > { %530 = vmatpush.msra.mxu3 %v267_v17  ;;  %329 = vmatpush.msra.mxu1 %v267_v17 }
  0x5c   : > { %515 = vmatpush.msra.mxu2 %v250_v18  ;;  %289 = vmatpush.msra.mxu0 %v250_v18 }
  0x5d   : > { %531 = vmatpush.msra.mxu3 %v266_v19  ;;  %330 = vmatpush.msra.mxu1 %v266_v19 }
  0x5e   : > { %516 = vmatpush.msra.mxu2 %v249_v20  ;;  %290 = vmatpush.msra.mxu0 %v249_v20 }
  0x5f   : > { %532 = vmatpush.msra.mxu3 %v265_v21  ;;  %331 = vmatpush.msra.mxu1 %v265_v21 }
  0x60   : > { %517 = vmatpush.msra.mxu2 %v248_v22  ;;  %291 = vmatpush.msra.mxu0 %v248_v22 }
  0x61   : > { %533 = vmatpush.msra.mxu3 %v264_v23  ;;  %332 = vmatpush.msra.mxu1 %v264_v23 }
  0x62   : > { %518 = vmatpush.msra.mxu2 %v247_v24  ;;  %292 = vmatpush.msra.mxu0 %v247_v24 }
  0x63   : > { %534 = vmatpush.msra.mxu3 %v263_v25  ;;  %333 = vmatpush.msra.mxu1 %v263_v25 }
  0x64   : > { %519 = vmatpush.msra.mxu2 %v246_v26  ;;  %293 = vmatpush.msra.mxu0 %v246_v26 }
  0x65   : > { %535 = vmatpush.msra.mxu3 %v262_v27  ;;  %334 = vmatpush.msra.mxu1 %v262_v27 }
  0x66   : > { %520 = vmatpush.msra.mxu2 %v245_v28  ;;  %294 = vmatpush.msra.mxu0 %v245_v28 }
  0x67   : > { %536 = vmatpush.msra.mxu3 %v261_v29  ;;  %335 = vmatpush.msra.mxu1 %v261_v29 }
  0x68   : > { %521 = vmatpush.msra.mxu2 %v244_v30  ;;  %295 = vmatpush.msra.mxu0 %v244_v30 }
  0x69   : > { %537 = vmatpush.msra.mxu3 %v260_v31  ;;  %308 = vmatmul.f32.vlgmr.msra.gmra.mxu2 %v236_v32 }
  0x6a   : > { %349 = vmatmul.f32.vlgmr.msra.gmra.mxu3 %v237_v33  ;;  %336 = vmatpush.msra.mxu1 %v260_v31 }
  0x6b   : > { %296 = vmatmul.f32.vlgmr.msra.gmra.mxu0 %v228_v34  ;;  %337 = vmatmul.f32.vlgmr.msra.gmra.mxu1 %v229_v35 }
  0x71   : > { %311 = vmatmul.f32.gmra.mxu2 %v238_v36 }
  0x72   : > { %352 = vmatmul.f32.gmra.mxu3 %v239_v37 }
  0x73   : > { %299 = vmatmul.f32.gmra.mxu0 %v230_v38  ;;  %340 = vmatmul.f32.gmra.mxu1 %v231_v39 }
  0x79   : > { %314 = vmatmul.f32.gmra.mxu2 %v240_v40 }
  0x7a   : > { %355 = vmatmul.f32.gmra.mxu3 %v241_v41 }
  0x7b   : > { %302 = vmatmul.f32.gmra.mxu0 %v232_v42  ;;  %343 = vmatmul.f32.gmra.mxu1 %v233_v43 }
  0x81   : > { %317 = vmatmul.f32.gmra.mxu2 %v242_v44 }
  0x82   : > { %358 = vmatmul.f32.gmra.mxu3 %v243_v45 }
  0x83   : > { %305 = vmatmul.f32.gmra.mxu0 %v234_v46  ;;  %346 = vmatmul.f32.gmra.mxu1 %v235_v47 }
  0xe8   : > { %v297_v49 = vpop.f32.mrf.mxu0  ;;  %v338_v50 = vpop.f32.mrf.mxu1 }
  0xe9   : > { %v298_v51 = vadd.f32 %v594_v48, %v297_v49 }
  0xeb   : > { %v339_v52 = vadd.f32 %v338_v50, %v298_v51 }
  0xec   : > { %v309_v53 = vpop.f32.mrf.mxu2 }
  0xed   : > { %v350_v54 = vpop.f32.mrf.mxu3  ;;  %v310_v55 = vadd.f32 %v594_v48, %v309_v53  ;;  %362 = vst [vmem:[%s932_s20] sm:$0xff] %v339_v52 }
  0xef   : > { %v351_v56 = vadd.f32 %v350_v54, %v310_v55 }
  0xf0   : > { %v300_v57 = vpop.f32.mrf.mxu0  ;;  %v341_v58 = vpop.f32.mrf.mxu1 }
  0xf1   : > { %366 = vst [vmem:[%s932_s20 + $0x20] sm:$0xff] %v351_v56  ;;  %v301_v59 = vadd.f32 %v594_v48, %v300_v57 }
  0xf3   : > { %v342_v60 = vadd.f32 %v341_v58, %v301_v59 }
  0xf4   : > { %v312_v61 = vpop.f32.mrf.mxu2 }
  0xf5   : > { %v353_v62 = vpop.f32.mrf.mxu3  ;;  %v313_v63 = vadd.f32 %v594_v48, %v312_v61  ;;  %363 = vst [vmem:[%s932_s20 + $0x8] sm:$0xff] %v342_v60 }
  0xf7   : > { %v354_v0 = vadd.f32 %v353_v62, %v313_v63 }
  0xf8   : > { %v303_v1 = vpop.f32.mrf.mxu0  ;;  %v344_v2 = vpop.f32.mrf.mxu1 }
  0xf9   : > { %367 = vst [vmem:[%s932_s20 + $0x28] sm:$0xff] %v354_v0  ;;  %v304_v3 = vadd.f32 %v594_v48, %v303_v1 }
  0xfb   : > { %v345_v4 = vadd.f32 %v344_v2, %v304_v3 }
  0xfc   : > { %v315_v5 = vpop.f32.mrf.mxu2 }
  0xfd   : > { %v356_v6 = vpop.f32.mrf.mxu3  ;;  %v316_v7 = vadd.f32 %v594_v48, %v315_v5  ;;  %364 = vst [vmem:[%s932_s20 + $0x10] sm:$0xff] %v345_v4 }
  0xff   : > { %v357_v8 = vadd.f32 %v356_v6, %v316_v7 }
 0x100   : > { %v306_v9 = vpop.f32.mrf.mxu0  ;;  %v347_v10 = vpop.f32.mrf.mxu1 }
 0x101   : > { %368 = vst [vmem:[%s932_s20 + $0x30] sm:$0xff] %v357_v8  ;;  %v307_v11 = vadd.f32 %v594_v48, %v306_v9 }
 0x103   : > { %v348_v12 = vadd.f32 %v347_v10, %v307_v11 }
 0x104   : > { %v318_v13 = vpop.f32.mrf.mxu2 }
 0x105   : > { %v359_v14 = vpop.f32.mrf.mxu3  ;;  %v319_v15 = vadd.f32 %v594_v48, %v318_v13  ;;  %365 = vst [vmem:[%s932_s20 + $0x18] sm:$0xff] %v348_v12  ;;  %377 = sbr.rel (!%p828_p11) target bundleno = 297 (0x129), region = 44 }
 0x107   : > { %v360_v16 = vadd.f32 %v359_v14, %v319_v15 }
 0x109   : > { %369 = vst [vmem:[%s932_s20 + $0x38] sm:$0xff] %v360_v16 }
 0x10a   : > { %s1026_s6 = smov (!%p380_p6, %s379_s6), 8 }
 0x10b   : > { %s495_s7 = sshll.u32 %s1026_s6, 3 }
 0x10c   : > { %s383_s30 = ssub.s32 64, %s495_s7 }
 0x10d   : > { %s384_s4 = sshll.u32 %s383_s30, 4 }
 0x10e   : > { %385 = vsyncadd %s371_s22, %s384_s4  ;;  %p951_p13 = scmp.ne.s32.totalorder %s495_s7, 0  ;;  %s505_s17 = sshll.u32 %s797_s16, 6 }
 0x10f   : > { %s388_s11 = scalar_lea.hbm %s1007_s3, %s505_s17  ;;  %s390_s27 = sshll.u32 %s932_s20, 4  ;;  %s960_s27 = int_to_ptr.vmem [resolvable:$true] %s390_s27 }
 0x110   : > { %s392_s28 = sshll.u32 %s388_s11, 4  ;;  %s499_s29 = sshll.u32 %s1026_s6, 7  ;;  %s962_s28 = int_to_ptr.hbm [resolvable:$true] %s392_s28 }
 0x111   : > { %s664_s23 = sshra.s32 %s960_s27, 4  ;;  %s666_s26 = sshrl.u32 %s499_s29, 4  ;;  %s665_s23 = int_to_ptr.vmem [resolvable:$true] %s664_s23 }
 0x112   : > { %s671_s10 = scalar_lea.vmem %s665_s23, %s666_s26  ;;  %s753_s16 = smov [#allocation7]  }
 0x113   : > { %p672_p11 = scmp.ne.s32.totalorder %s665_s23, %s671_s10  ;;  %s675_s5 = scalar_lea.vmem %s753_s16, 128 }
 0x114   : > { %p677_p10 = scmp.lt.s32.totalorder %s675_s5, %s671_s10 }
 0x115   : > { %p673_p5 = pnand %p672_p11, %p951_p13 }
 0x117   : > { %p674_p9 = pneg %p673_p5 }
 0x119   : > { %p679_p1 = pnand %p677_p10, %p674_p9 }
 0x11b   : > { %682 = shalt.err (!%p679_p1)
}
 0x11c   : > { %s683_s20 = sshra.s32 %s962_s28, 4  ;;  %s694_s17 = scalar_lea.hbm %s1007_s3, 160  ;;  %s684_s20 = int_to_ptr.hbm [resolvable:$true] %s683_s20 }
 0x11d   : > { %s690_s7 = scalar_lea.hbm %s684_s20, %s666_s26  ;;  %p695_p7 = scmp.lt.s32.totalorder %s684_s20, %s1007_s3 }
 0x11e   : > { %p691_p0 = scmp.ne.s32.totalorder %s684_s20, %s690_s7  ;;  %p696_p8 = scmp.lt.s32.totalorder %s694_s17, %s690_s7 }
 0x120   : > { %p692_p2 = pnand %p691_p0, %p951_p13  ;;  %p697_p4 = por %p696_p8, %p695_p7 }
 0x122   : > { %p693_p3 = pneg %p692_p2 }
 0x124   : > { %p698_p12 = pnand %p697_p4, %p693_p3 }
 0x126   : > { %701 = shalt.err (!%p698_p12)
}
 0x127   : > { %s754_s11 = smov 128   ;;  %s755_s23 = smov 8  }
 0x128   : > { %398 = dma.vmem_to_hbm [thread:$0]  (%p951_p13), %s960_s27, %s499_s29, %s962_s28, %s371_s22, %s754_s11, %s754_s11, %s755_s23  }
 0x129 PF: > { %p554_p6 = scmp.ge.s32.totalorder %s745_s15, 2  ;;  %s407_s26 = sand.u32 1, %s733_s12  }
 0x12a   : > { %p1018_p11 = scmp.ne.s32.totalorder %s1012_s25, 0  ;;  %s408_s10 = scalar_lea.sflag [#allocation4], %s407_s26 }
 0x12c   : > { %p549_p5 = pnand %p554_p6, %p1018_p11 }
 0x12e   : > { %p550_p9 = pneg %p549_p5 }
 0x130   : > { %728 = dma.done.wait (%p550_p9), %s408_s10, 1024  }
 0x131   : > { %730 = vsyncadd (%p550_p9), %s408_s10, 4294966272  ;;  %p17_p10 = scmp.ge.s32.totalorder %s801_s18, 5   ;;  %s1019_s12 = smov %s737_s13 }
 0x132   : > { %s1020_s13 = smov %s741_s14  ;;  %s1021_s14 = smov %s813_s21 }
 0x133   : > { %s1022_s15 = smov %s801_s18  ;;  %19 = sbr.rel (!%p17_p10) target bundleno = 6 (0x6), region = 81 }
 0x138   :  { %414 = vsyncpa [#allocation3], 1 }
 0x139   :  { %416 = vsyncpa [#allocation3 + $0x1], 1 }
 0x13a   :  { %417 = vsyncpa [#allocation6], 1 }
 0x13b   :  { %418 = vsyncpa [#allocation4], 1 }
 0x13c   :  { %420 = vsyncpa [#allocation4 + $0x1], 1 }

</bundles_post_ra>
